<compile_context>
chip_gen: v6e
topology: v6e:2x2x1
jax: 0.10.0
libtpu: 0.0.40
codegen_flags: <defaults>
</compile_context>

<pallas_src>
import jax
import jax.numpy as jnp
from jax.experimental import pallas as pl
from jax.experimental.pallas import tpu as pltpu


def _svd_stats_kernel(src_ref, tgt_ref, w_ref, out_ref):
    # src_ref/tgt_ref block: (TB, C, N)  — keypoints N on the lane axis.
    # w_ref block:           (TB, 1, N)
    # out_ref block:         (TB, C*(C+2)) packed [W rows | src_c | tgt_c]
    src = src_ref[...]                                   # (TB, C, N)
    tgt = tgt_ref[...]                                   # (TB, C, N)
    w = w_ref[...]                                       # (TB, 1, N)
    C = src.shape[1]

    # weighted-sum normalizer (matches torch: sum + 0.0001)
    wsum = jnp.sum(w, axis=-1, keepdims=True) + 1e-4     # (TB, 1, 1)
    wsum_2d = wsum[:, 0, :]                              # (TB, 1)

    # weighted centroids (lane reduction)
    src_c = jnp.sum(src * w, axis=-1, keepdims=True) / wsum   # (TB, C, 1)
    tgt_c = jnp.sum(tgt * w, axis=-1, keepdims=True) / wsum   # (TB, C, 1)

    src_cen = src - src_c                                # (TB, C, N)
    tgt_cen = tgt - tgt_c                                # (TB, C, N)
    A = tgt_cen * w                                      # (TB, C, N)

    # W[i, j] = sum_n A[:, i, n] * src_cen[:, j, n] / wsum
    # (broadcast-multiply + lane reduce; stays on VPU/XLU, no MXU)
    for i in range(C):
        row = jnp.sum(A[:, i:i + 1, :] * src_cen, axis=-1)     # (TB, C)
        out_ref[:, i * C:(i + 1) * C] = (row / wsum_2d).astype(out_ref.dtype)

    out_ref[:, C * C:C * C + C] = src_c[:, :, 0].astype(out_ref.dtype)
    out_ref[:, C * C + C:C * C + 2 * C] = tgt_c[:, :, 0].astype(out_ref.dtype)


def _weighted_stats_pallas(src_t, tgt_t, weights):
    """src_t, tgt_t: (B, C, N) f32; weights: (B, 1, N) f32.
    Returns packed stats (B, C*(C+2)) f32: [W rows (C*C), src_c (C), tgt_c (C)]."""
    B, C, N = src_t.shape
    P = C * (C + 2)

    # Batch tiling: 8 batches per grid step (fills the 8 sublanes of the packed
    # output block); small B uses a single full-batch block.
    if B <= 8:
        TB, B_pad = B, B
    else:
        TB = 8
        B_pad = ((B + 7) // 8) * 8
    if B_pad != B:
        pad = ((0, B_pad - B), (0, 0), (0, 0))
        src_t = jnp.pad(src_t, pad)
        tgt_t = jnp.pad(tgt_t, pad)
        weights = jnp.pad(weights, pad)

    grid_spec = pl.GridSpec(
        grid=(B_pad // TB,),
        in_specs=[
            pl.BlockSpec((TB, C, N), lambda b: (b, 0, 0)),
            pl.BlockSpec((TB, C, N), lambda b: (b, 0, 0)),
            pl.BlockSpec((TB, 1, N), lambda b: (b, 0, 0)),
        ],
        out_specs=pl.BlockSpec((TB, P), lambda b: (b, 0)),
    )
    packed = pl.pallas_call(
        _svd_stats_kernel,
        grid_spec=grid_spec,
        out_shape=jax.ShapeDtypeStruct((B_pad, P), jnp.float32),
        compiler_params=pltpu.CompilerParams(
            dimension_semantics=("parallel",)),
    )(src_t, tgt_t, weights)
    return packed[:B]


def svd_forward(src_coords, tgt_coords, weights):
    """Mirror of SVD.forward(convert_from_pixels=False).
    Args:
      src_coords: (B, N, C) f32 (C <= 3, typically 2)
      tgt_coords: (B, N, C) f32
      weights:    (B, 1, N) f32
    Returns:
      R_tgt_src:       (B, 3, 3)
      t_src_tgt_intgt: (B, 3, 1)
    """
    B, N, C = src_coords.shape

    # lane-major keypoints for the kernel; weights are already (B, 1, N)
    src_t = jnp.swapaxes(src_coords.astype(jnp.float32), 1, 2)   # (B, C, N)
    tgt_t = jnp.swapaxes(tgt_coords.astype(jnp.float32), 1, 2)   # (B, C, N)
    w = weights.astype(jnp.float32)                              # (B, 1, N)

    packed = _weighted_stats_pallas(src_t, tgt_t, w)             # (B, C*(C+2))
    W_sub = packed[:, :C * C].reshape(B, C, C)
    src_c_sub = packed[:, C * C:C * C + C]                       # (B, C)
    tgt_c_sub = packed[:, C * C + C:C * C + 2 * C]               # (B, C)

    # Assemble the 3x3 / 3x1 quantities (zero z-channel == torch's F.pad path).
    pad = 3 - C
    Wmat = jnp.pad(W_sub, ((0, 0), (0, pad), (0, pad)))          # (B, 3, 3)
    src_centroid = jnp.pad(src_c_sub, ((0, 0), (0, pad)))[:, :, None]  # (B, 3, 1)
    tgt_centroid = jnp.pad(tgt_c_sub, ((0, 0), (0, pad)))[:, :, None]  # (B, 3, 1)

    # --- tiny 3x3 linear algebra (no Pallas equivalent for SVD/det) ---
    U, _, Vh = jnp.linalg.svd(Wmat)
    V = jnp.swapaxes(Vh, -2, -1)                                 # real -> conj is no-op
    det_UV = jnp.linalg.det(U) * jnp.linalg.det(V)               # (B,)
    diag = jnp.concatenate(
        [jnp.ones((B, 2), dtype=V.dtype), det_UV[:, None]], axis=1)
    S = jax.vmap(jnp.diag)(diag)                                 # (B, 3, 3)
    R_tgt_src = U @ S @ jnp.swapaxes(V, 1, 2)                    # (B, 3, 3)

    t_tgt_src_insrc = src_centroid - jnp.swapaxes(R_tgt_src, 1, 2) @ tgt_centroid
    t_src_tgt_intgt = -(R_tgt_src @ t_tgt_src_insrc)
    return R_tgt_src, t_src_tgt_intgt


def _reference_stats(src_t, tgt_t, weights):
    """Pure-JAX reference for the kernel outputs. src_t/tgt_t: (B,C,N), weights (B,1,N)."""
    w = jnp.sum(weights, axis=2, keepdims=True) + 1e-4           # (B,1,1)
    src_c = jnp.sum(src_t * weights, axis=2, keepdims=True) / w  # (B,C,1)
    tgt_c = jnp.sum(tgt_t * weights, axis=2, keepdims=True) / w
    src_cen = src_t - src_c
    tgt_cen = tgt_t - tgt_c
    Wm = (tgt_cen * weights) @ jnp.swapaxes(src_cen, 1, 2) / w   # (B,C,C)
    return Wm, src_c, tgt_c


if __name__ == "__main__":
    key = jax.random.PRNGKey(0)
    k1, k2, k3 = jax.random.split(key, 3)
    B, N, C = 2, 8, 2
    src = jax.random.normal(k1, (B, N, C), dtype=jnp.float32) * 5.0
    tgt = jax.random.normal(k2, (B, N, C), dtype=jnp.float32) * 5.0
    weights = jax.nn.softplus(jax.random.normal(k3, (B, 1, N), dtype=jnp.float32))

    R, t = svd_forward(src, tgt, weights)
    R = jax.block_until_ready(R)
    t = jax.block_until_ready(t)
    assert R.shape == (B, 3, 3) and t.shape == (B, 3, 1)

    # sanity check of the Pallas-computed statistics against pure JAX
    src_t = jnp.swapaxes(src, 1, 2)
    tgt_t = jnp.swapaxes(tgt, 1, 2)
    packed = _weighted_stats_pallas(src_t, tgt_t, weights)
    W_k = packed[:, :C * C].reshape(B, C, C)
    sc_k = packed[:, C * C:C * C + C][:, :, None]
    tc_k = packed[:, C * C + C:C * C + 2 * C][:, :, None]
    W_r, sc_r, tc_r = _reference_stats(src_t, tgt_t, weights)
    assert jnp.allclose(W_k, W_r, atol=1e-5)
    assert jnp.allclose(sc_k, sc_r, atol=1e-5)
    assert jnp.allclose(tc_k, tc_r, atol=1e-5)

    # R should be a valid rotation
    eye = jnp.eye(3)[None].repeat(B, axis=0)
    assert jnp.allclose(R @ jnp.swapaxes(R, 1, 2), eye, atol=1e-4)

    print("KERNEL_OK")
</pallas_src>

<mosaic_0001>
module attributes {stable_mosaic.version = 11 : i64} {
  func.func @_svd_stats_kernel(%arg0: i32, %arg1: memref<2x2x8xf32, #tpu.memory_space<vmem>>, %arg2: memref<2x2x8xf32, #tpu.memory_space<vmem>>, %arg3: memref<2x1x8xf32, #tpu.memory_space<vmem>>, %arg4: memref<2x8xf32, #tpu.memory_space<vmem>>) attributes {dimension_semantics = [#tpu.dimension_semantics<parallel>], iteration_bounds = array<i64: 1>, scalar_prefetch = 0 : i64, scratch_operands = 0 : i64, tpu.core_type = #tpu.core_type<tc>, window_params = [{transform_indices = @transform_0, window_bounds = array<i64: 2, 2, 8>}, {transform_indices = @transform_1, window_bounds = array<i64: 2, 2, 8>}, {transform_indices = @transform_2, window_bounds = array<i64: 2, 1, 8>}, {transform_indices = @transform_3, window_bounds = array<i64: 2, 8>}]} {
    %c0 = arith.constant 0 : index
    %c0_0 = arith.constant 0 : index
    %c0_1 = arith.constant 0 : index
    %0 = vector.load %arg1[%c0, %c0_0, %c0_1] : memref<2x2x8xf32, #tpu.memory_space<vmem>>, vector<2x2x8xf32>
    %c0_2 = arith.constant 0 : index
    %c0_3 = arith.constant 0 : index
    %c0_4 = arith.constant 0 : index
    %1 = vector.load %arg2[%c0_2, %c0_3, %c0_4] : memref<2x2x8xf32, #tpu.memory_space<vmem>>, vector<2x2x8xf32>
    %c0_5 = arith.constant 0 : index
    %c0_6 = arith.constant 0 : index
    %c0_7 = arith.constant 0 : index
    %2 = vector.load %arg3[%c0_5, %c0_6, %c0_7] : memref<2x1x8xf32, #tpu.memory_space<vmem>>, vector<2x1x8xf32>
    %cst = arith.constant dense<0.000000e+00> : vector<2x1xf32>
    %3 = vector.multi_reduction <add>, %2, %cst [2] : vector<2x1x8xf32> to vector<2x1xf32>
    %4 = vector.shape_cast %3 : vector<2x1xf32> to vector<2x1x1xf32>
    %cst_8 = arith.constant 9.99999974E-5 : f32
    %5 = vector.broadcast %cst_8 : f32 to vector<2x1x1xf32>
    %6 = arith.addf %4, %5 : vector<2x1x1xf32>
    %7 = vector.shape_cast %6 : vector<2x1x1xf32> to vector<2x1xf32>
    %8 = vector.broadcast %2 : vector<2x1x8xf32> to vector<2x2x8xf32>
    %9 = arith.mulf %0, %8 : vector<2x2x8xf32>
    %cst_9 = arith.constant dense<0.000000e+00> : vector<2x2xf32>
    %10 = vector.multi_reduction <add>, %9, %cst_9 [2] : vector<2x2x8xf32> to vector<2x2xf32>
    %11 = vector.shape_cast %10 : vector<2x2xf32> to vector<2x2x1xf32>
    %12 = vector.broadcast %6 : vector<2x1x1xf32> to vector<2x2x1xf32>
    %13 = arith.divf %11, %12 : vector<2x2x1xf32>
    %14 = vector.broadcast %2 : vector<2x1x8xf32> to vector<2x2x8xf32>
    %15 = arith.mulf %1, %14 : vector<2x2x8xf32>
    %cst_10 = arith.constant dense<0.000000e+00> : vector<2x2xf32>
    %16 = vector.multi_reduction <add>, %15, %cst_10 [2] : vector<2x2x8xf32> to vector<2x2xf32>
    %17 = vector.shape_cast %16 : vector<2x2xf32> to vector<2x2x1xf32>
    %18 = vector.broadcast %6 : vector<2x1x1xf32> to vector<2x2x1xf32>
    %19 = arith.divf %17, %18 : vector<2x2x1xf32>
    %20 = vector.broadcast %13 : vector<2x2x1xf32> to vector<2x2x8xf32>
    %21 = arith.subf %0, %20 : vector<2x2x8xf32>
    %22 = vector.broadcast %19 : vector<2x2x1xf32> to vector<2x2x8xf32>
    %23 = arith.subf %1, %22 : vector<2x2x8xf32>
    %24 = vector.broadcast %2 : vector<2x1x8xf32> to vector<2x2x8xf32>
    %25 = arith.mulf %23, %24 : vector<2x2x8xf32>
    %26 = vector.extract_strided_slice %25 {offsets = [0, 0, 0], sizes = [2, 1, 8], strides = [1, 1, 1]} : vector<2x2x8xf32> to vector<2x1x8xf32>
    %27 = vector.broadcast %26 : vector<2x1x8xf32> to vector<2x2x8xf32>
    %28 = arith.mulf %27, %21 : vector<2x2x8xf32>
    %cst_11 = arith.constant dense<0.000000e+00> : vector<2x2xf32>
    %29 = vector.multi_reduction <add>, %28, %cst_11 [2] : vector<2x2x8xf32> to vector<2x2xf32>
    %30 = vector.broadcast %7 : vector<2x1xf32> to vector<2x2xf32>
    %31 = arith.divf %29, %30 : vector<2x2xf32>
    %c0_12 = arith.constant 0 : index
    %c0_13 = arith.constant 0 : index
    %32 = vector.load %arg4[%c0_12, %c0_13] : memref<2x8xf32, #tpu.memory_space<vmem>>, vector<2x2xf32>
    tpu.vector_store %arg4[%c0_12, %c0_13], %31 {strides = array<i32>} : memref<2x8xf32, #tpu.memory_space<vmem>>, vector<2x2xf32>,
    %33 = vector.extract_strided_slice %25 {offsets = [0, 1, 0], sizes = [2, 1, 8], strides = [1, 1, 1]} : vector<2x2x8xf32> to vector<2x1x8xf32>
    %34 = vector.broadcast %33 : vector<2x1x8xf32> to vector<2x2x8xf32>
    %35 = arith.mulf %34, %21 : vector<2x2x8xf32>
    %cst_14 = arith.constant dense<0.000000e+00> : vector<2x2xf32>
    %36 = vector.multi_reduction <add>, %35, %cst_14 [2] : vector<2x2x8xf32> to vector<2x2xf32>
    %37 = vector.broadcast %7 : vector<2x1xf32> to vector<2x2xf32>
    %38 = arith.divf %36, %37 : vector<2x2xf32>
    %c0_15 = arith.constant 0 : index
    %c2 = arith.constant 2 : index
    %39 = vector.load %arg4[%c0_15, %c2] : memref<2x8xf32, #tpu.memory_space<vmem>>, vector<2x2xf32>
    tpu.vector_store %arg4[%c0_15, %c2], %38 {strides = array<i32>} : memref<2x8xf32, #tpu.memory_space<vmem>>, vector<2x2xf32>,
    %40 = vector.shape_cast %13 : vector<2x2x1xf32> to vector<2x2xf32>
    %c0_16 = arith.constant 0 : index
    %c4 = arith.constant 4 : index
    %41 = vector.load %arg4[%c0_16, %c4] : memref<2x8xf32, #tpu.memory_space<vmem>>, vector<2x2xf32>
    tpu.vector_store %arg4[%c0_16, %c4], %40 {strides = array<i32>} : memref<2x8xf32, #tpu.memory_space<vmem>>, vector<2x2xf32>,
    %42 = vector.shape_cast %19 : vector<2x2x1xf32> to vector<2x2xf32>
    %c0_17 = arith.constant 0 : index
    %c6 = arith.constant 6 : index
    %43 = vector.load %arg4[%c0_17, %c6] : memref<2x8xf32, #tpu.memory_space<vmem>>, vector<2x2xf32>
    tpu.vector_store %arg4[%c0_17, %c6], %42 {strides = array<i32>} : memref<2x8xf32, #tpu.memory_space<vmem>>, vector<2x2xf32>,
    return
  }
  func.func @transform_0(%arg0: i32) -> (i32, i32, i32) {
    %c0_i32 = arith.constant 0 : i32
    %c0_i32_0 = arith.constant 0 : i32
    %c0_i32_1 = arith.constant 0 : i32
    return %arg0, %c0_i32, %c0_i32_0 : i32, i32, i32
  }
  func.func @transform_1(%arg0: i32) -> (i32, i32, i32) {
    %c0_i32 = arith.constant 0 : i32
    %c0_i32_0 = arith.constant 0 : i32
    %c0_i32_1 = arith.constant 0 : i32
    return %arg0, %c0_i32, %c0_i32_0 : i32, i32, i32
  }
  func.func @transform_2(%arg0: i32) -> (i32, i32, i32) {
    %c0_i32 = arith.constant 0 : i32
    %c0_i32_0 = arith.constant 0 : i32
    %c0_i32_1 = arith.constant 0 : i32
    return %arg0, %c0_i32, %c0_i32_0 : i32, i32, i32
  }
  func.func @transform_3(%arg0: i32) -> (i32, i32) {
    %c0_i32 = arith.constant 0 : i32
    %c0_i32_0 = arith.constant 0 : i32
    return %arg0, %c0_i32 : i32, i32
  }
}

</mosaic_0001>

<bundles_post_ra>
// kernel: tpu_custom_call.1
= control target key start
LH: loop header
LB: loop body
LE: loop exit
PB: predicated region body
PF: predicated region fallthrough
CT: control target
= control target key end

     0   :  { %8 = vsyncpa [#allocation3], 0  ;;  %s400_s0 = inlined_call_operand.hbm [shape: f32[2,2,8], index: 0, kind: input, shape index: {}]   ;;  %s401_s1 = inlined_call_operand.hbm [shape: f32[2,2,8], index: 1, kind: input, shape index: {}]   ;;  %s402_s2 = inlined_call_operand.vmem [shape: f32[2,1,8], index: 2, kind: input, shape index: {}]   ;;  %s403_s3 = inlined_call_operand.hbm [shape: f32[2,8], index: 3, kind: output, shape index: {}]  }
   0x1   :  { %9 = vsyncpa [#allocation6], 0 }
   0x2   :  { %10 = vsyncpa [#allocation4], 0  ;;  %s325_s12 = smov [#allocation2]  }
   0x3   :  { %s16_s13 = sshll.u32 %s325_s12, 4  ;;  %s17_s13 = int_to_ptr.vmem [resolvable:$true] %s16_s13 }
   0x4   :  { %s267_s14 = scalar_lea.vmem %s17_s13, 64  ;;  %p272_p1 = scmp.lt.s32.totalorder %s17_s13, %s17_s13 }
   0x5   :  { %p268_p0 = scmp.ne.s32.totalorder %s17_s13, %s267_s14  ;;  %p273_p2 = scmp.lt.s32.totalorder %s267_s14, %s267_s14 }
   0x7   :  { %p274_p3 = por %p273_p2, %p272_p1 }
   0x9   :  { %p275_p4 = pnand %p274_p3, %p268_p0 }
   0xb   :  { %278 = shalt.err (!%p275_p4)
}
   0xc   :  { %s326_s15 = smov 32   ;;  %s327_s16 = smov 2  }
   0xd   :  { %22 = dma.hbm_to_vmem [thread:$0]  %s400_s0, 64, %s17_s13, [#allocation3], %s326_s15, %s326_s15, %s327_s16  }
   0xe   :  { %s328_s19 = smov [#allocation5]  }
   0xf   :  { %s28_s20 = sshll.u32 %s328_s19, 4  ;;  %s29_s20 = int_to_ptr.vmem [resolvable:$true] %s28_s20 }
  0x10   :  { %s287_s21 = scalar_lea.vmem %s29_s20, 64  ;;  %p292_p6 = scmp.lt.s32.totalorder %s29_s20, %s29_s20 }
  0x11   :  { %p288_p5 = scmp.ne.s32.totalorder %s29_s20, %s287_s21  ;;  %p293_p7 = scmp.lt.s32.totalorder %s287_s21, %s287_s21 }
  0x13   :  { %p294_p8 = por %p293_p7, %p292_p6 }
  0x15   :  { %p295_p9 = pnand %p294_p8, %p288_p5 }
  0x17   :  { %298 = shalt.err (!%p295_p9)
}
  0x18   :  { %34 = dma.hbm_to_vmem [thread:$0]  %s401_s1, 64, %s29_s20, [#allocation6], %s326_s15, %s326_s15, %s327_s16  }
  0x19   :  { %319 = dma.done.wait [#allocation3], 64  }
  0x1a   :  { %320 = vsyncadd [#allocation3], 4294967232 }
  0x1b   :  { %321 = dma.done.wait [#allocation6], 64  }
  0x1c   :  { %322 = vsyncadd [#allocation6], 4294967232  ;;  %v60_v0 = vlaneseq  ;;  %vm49_vm0 = vcmask 57344   ;;  %v47_v3 = vld [vmem:[%s402_s2] sm:$0x1]  ;;  %vm72_vm1 = vcmask 58368  }
  0x1d   :  { %v48_v4 = vld [vmem:[%s402_s2 + $0x1] sm:$0x1]  ;;  %v45_v5 = vld [vmem:[#allocation5] sm:$0x3]  ;;  %v50_v6 = vsel %vm49_vm0, %v47_v3, 0.0  ;;  %vm157_vm2 = vcmask 1041409  }
  0x1e   :  { %v357_v1 = vshrl.u32 %v60_v0, 7  ;;  %v46_v9 = vld [vmem:[#allocation5 + $0x2] sm:$0x3]  ;;  %v43_v10 = vld [vmem:[#allocation2] sm:$0x3]  ;;  %51 = vadd.xlane.f32.xlu0 %v50_v6  ;;  %v53_v11 = vsel %vm49_vm0, %v48_v4, 0.0 }
  0x1f   :  { %v44_v15 = vld [vmem:[#allocation2 + $0x2] sm:$0x3]  ;;  %v376_v28 = vand.u32 127, %v60_v0  ;;  %vm160_vm3 = vcmask 9216   ;;  %vm199_vm4 = vcmask 25616   ;;  %s330_s1 = smov [#allocation7]  }
  0x20   :  { %v360_v2 = vsub.s32 0, %v357_v1  ;;  %v164_v43 = vsub.s32 1, %v357_v1  ;;  %s237_s2 = sshll.u32 %s330_s1, 4  ;;  %vm214_vm5 = vcmask 42016   ;;  %vm229_vm6 = vcmask 58416   ;;  %s238_s2 = int_to_ptr.vmem [resolvable:$true] %s237_s2 }
  0x21   :  { %v218_v29 = vadd.s32 4294967290, %v376_v28  ;;  %v203_v30 = vadd.s32 4294967292, %v376_v28  ;;  %s299_s27 = scalar_lea.vmem %s238_s2, 32  ;;  %p304_p11 = scmp.lt.s32.totalorder %s238_s2, %s238_s2 }
  0x22   :  { %v63_v7 = vrot.slane %v47_v3, %v360_v2  ;;  %v67_v8 = vrot.slane %v48_v4, %v360_v2  ;;  %54 = vadd.xlane.f32.xlu0 %v53_v11  ;;  %p300_p10 = scmp.ne.s32.totalorder %s238_s2, %s299_s27  ;;  %p305_p12 = scmp.lt.s32.totalorder %s299_s27, %s299_s27 }
  0x23   :  { %v221_v33 = vsub.s32 %v218_v29, %v357_v1  ;;  %v206_v34 = vsub.s32 %v203_v30, %v357_v1 }
  0x24   :  { %v91_v12 = vmul.f32 %v63_v7, %v45_v5  ;;  %v92_v13 = vmul.f32 %v67_v8, %v46_v9  ;;  %v70_v14 = vmul.f32 %v63_v7, %v43_v10  ;;  %v71_v19 = vmul.f32 %v67_v8, %v44_v15  ;;  %p306_p13 = por %p305_p12, %p304_p11 }
  0x26   :  { %v93_v16 = vsel %vm72_vm1, %v91_v12, 0.0  ;;  %v96_v17 = vsel %vm72_vm1, %v92_v13, 0.0  ;;  %v73_v18 = vsel %vm72_vm1, %v70_v14, 0.0  ;;  %v76_v20 = vsel %vm72_vm1, %v71_v19, 0.0  ;;  %p307_p0 = pnand %p306_p13, %p300_p10 }
  0x27   :  { %94 = vadd.xlane.f32.xlu1 %v93_v16  ;;  %74 = vadd.xlane.f32.xlu0 %v73_v18  ;;  %v151_v13 = vsub.s32 %v376_v28, %v357_v1  ;;  %v188_v18 = vadd.s32 4294967294, %v376_v28 }
  0x2b   :  { %97 = vadd.xlane.f32.xlu1 %v96_v17 }
  0x2f   :  { %77 = vadd.xlane.f32.xlu1 %v76_v20 }
  0xa7   :  { %v52_v21 = vpop.xlane.xlu0 %51 }
  0xa8   :  { %v56_v22 = vadd.f32 0.0001, %v52_v21  ;;  %v191_v21 = vsub.s32 %v188_v18, %v357_v1 }
  0xaa   :  { %v82_v23 = vrot.slane %v56_v22, %v360_v2 }
  0xab   :  { %v55_v24 = vpop.xlane.xlu0 %54 }
  0xac   :  { %255 = vrcp.f32 %v82_v23  ;;  %v57_v25 = vadd.f32 0.0001, %v55_v24 }
  0xae   :  { %v86_v26 = vrot.slane %v57_v25, %v360_v2 }
  0xb0   :  { %v95_v27 = vpop.xlane.xlu1 %94  ;;  %257 = vrcp.f32 %v86_v26  ;;  %v75_v32 = vpop.xlane.xlu0 %74 }
  0xb4   :  { %v98_v31 = vpop.xlane.xlu1 %97 }
  0xb8   :  { %v78_v38 = vpop.xlane.xlu1 %77 }
  0xb9   :  { %v256_v35 = vpop.eup %255 }
  0xba   :  { %v99_v36 = vmul.f32 %v256_v35, %v95_v27  ;;  %v88_v37 = vmul.f32 %v256_v35, %v75_v32 }
  0xbc   :  { %v103_v39 = vsub.f32 %v45_v5, %v99_v36  ;;  %v222_v40 = vrot.slane %v99_v36, %v221_v33  ;;  %v207_v41 = vrot.slane %v88_v37, %v206_v34  ;;  %v101_v50 = vsub.f32 %v43_v10, %v88_v37 }
  0xbd   :  { %v258_v42 = vpop.eup %257  ;;  %v329_v5 = vmov 0  }
  0xbe   :  { %v105_v44 = vmul.f32 %v103_v39, %v63_v7  ;;  %v100_v45 = vmul.f32 %v258_v42, %v98_v31  ;;  %v90_v46 = vmul.f32 %v258_v42, %v78_v38  ;;  %253 = vset.pattern.permute.xlu0 %v329_v5  ;;  %254 = vset.pattern.permute.xlu1 %v329_v5 }
  0xc0   :  { %v104_v47 = vsub.f32 %v46_v9, %v100_v45  ;;  %v226_v48 = vrot.slane %v100_v45, %v221_v33  ;;  %v211_v49 = vrot.slane %v90_v46, %v206_v34  ;;  %v110_v51 = vrot.slane %v105_v44, %v360_v2 }
  0xc1   :  { %v165_v52 = vrot.slane %v105_v44, %v164_v43  ;;  %v102_v57 = vsub.f32 %v44_v15, %v90_v46 }
  0xc2   :  { %v106_v53 = vmul.f32 %v104_v47, %v67_v8  ;;  %v212_v54 = vsel %vm157_vm2, %v211_v49, %v207_v41  ;;  %v227_v55 = vsel %vm157_vm2, %v226_v48, %v222_v40  ;;  %v115_v56 = vmul.f32 %v110_v51, %v101_v50 }
  0xc3   :  { %v170_v61 = vmul.f32 %v165_v52, %v101_v50 }
  0xc4   :  { %v114_v58 = vrot.slane %v106_v53, %v360_v2  ;;  %v169_v59 = vrot.slane %v106_v53, %v164_v43  ;;  %v117_v60 = vsel %vm72_vm1, %v115_v56, 0.0 }
  0xc5   :  { %118 = vadd.xlane.f32.xlu0 %v117_v60  ;;  %v172_v3 = vsel %vm72_vm1, %v170_v61, 0.0 }
  0xc6   :  { %v116_v62 = vmul.f32 %v114_v58, %v102_v57  ;;  %v171_v0 = vmul.f32 %v169_v59, %v102_v57 }
  0xc8   :  { %v120_v63 = vsel %vm72_vm1, %v116_v62, 0.0  ;;  %v175_v4 = vsel %vm72_vm1, %v171_v0, 0.0 }
  0xc9   :  { %121 = vadd.xlane.f32.xlu1 %v120_v63  ;;  %173 = vadd.xlane.f32.xlu0 %v172_v3 }
  0xcd   :  { %176 = vadd.xlane.f32.xlu1 %v175_v4 }
 0x14e   :  { %v119_v2 = vpop.xlane.xlu0 %118 }
 0x14f   :  { %v136_v6 = vmul.f32 %v256_v35, %v119_v2 }
 0x151   :  { %142 = vperm.xlu0 %253, %v136_v6  }
 0x152   :  { %v122_v7 = vpop.xlane.xlu1 %121  ;;  %v174_v9 = vpop.xlane.xlu0 %173 }
 0x153   :  { %v138_v8 = vmul.f32 %v258_v42, %v122_v7  ;;  %v178_v10 = vmul.f32 %v256_v35, %v174_v9 }
 0x155   :  { %145 = vperm.xlu1 %254, %v138_v8  }
 0x156   :  { %v177_v11 = vpop.xlane.xlu1 %176 }
 0x157   :  { %v179_v12 = vmul.f32 %v258_v42, %v177_v11 }
 0x159   :  { %183 = vperm.xlu1 %254, %v178_v10  }
 0x15d   :  { %186 = vperm.xlu1 %254, %v179_v12  }
 0x1cc   :  { %v143_v14 = vpop.permute.xlu0 %142 }
 0x1cd   :  { %v152_v16 = vrot.slane %v143_v14, %v151_v13 }
 0x1d0   :  { %v146_v15 = vpop.permute.xlu1 %145 }
 0x1d1   :  { %v156_v17 = vrot.slane %v146_v15, %v151_v13 }
 0x1d3   :  { %v158_v19 = vsel %vm157_vm2, %v156_v17, %v152_v16 }
 0x1d4   :  { %161 = vst.msk [vmem:[#allocation7] sm:$0x3] %vm160_vm3, %v158_v19  ;;  %v184_v20 = vpop.permute.xlu1 %183 }
 0x1d5   :  { %v192_v23 = vrot.slane %v184_v20, %v191_v21 }
 0x1d8   :  { %v187_v22 = vpop.permute.xlu1 %186 }
 0x1d9   :  { %v196_v24 = vrot.slane %v187_v22, %v191_v21 }
 0x1db   :  { %v197_v25 = vsel %vm157_vm2, %v196_v24, %v192_v23 }
 0x1dc   :  { %200 = vst.msk [vmem:[#allocation7] sm:$0x3] %vm199_vm4, %v197_v25 }
 0x1dd   :  { %215 = vst.msk [vmem:[#allocation7] sm:$0x3] %vm214_vm5, %v212_v54 }
 0x1de   :  { %230 = vst.msk [vmem:[#allocation7] sm:$0x3] %vm229_vm6, %v227_v55 }
 0x1df   :  { %310 = shalt.err (!%p307_p0)
}
 0x1e0   :  { %240 = dma.vmem_to_hbm [thread:$0]  %s238_s2, 32, %s403_s3, [#allocation4]  }
 0x1e1   :  { %323 = dma.done.wait [#allocation4], 32  }
 0x1e2   :  { %324 = vsyncadd [#allocation4], 4294967264 }
 0x1e3   :  { %244 = vsyncpa [#allocation3], 1 }
 0x1e4   :  { %245 = vsyncpa [#allocation6], 1 }
 0x1e5   :  { %246 = vsyncpa [#allocation4], 1 }

</bundles_post_ra>
